<compile_context>
chip_gen: v5e
topology: v5e:2x2
jax: 0.10.0
libtpu: 0.0.40
codegen_flags: <defaults>
</compile_context>

<pallas_src>
import functools
import math

import jax
import jax.numpy as jnp
from jax.experimental import pallas as pl
from jax.experimental.pallas import tpu as pltpu


# ----------------------------------------------------------------------------
# Small helpers
# ----------------------------------------------------------------------------
def _round_up(x, m):
    return ((x + m - 1) // m) * m


def _choose_tile(size, target):
    """Largest multiple-of-8 divisor of `size` that is <= target, else `size`.

    Returning the full dim is always legal for a BlockSpec (block == array dim).
    """
    t = min(target, size)
    start = t - (t % 8)
    for cand in range(start, 0, -8):
        if size % cand == 0:
            return cand
    return size


def _vmem_limit(working_set_bytes):
    # Working set (already counts double-buffering) + slack; stays above the
    # 16 MiB default scoped limit and under ~48 MiB (v7x has 64 MiB physical).
    return int(min(max(working_set_bytes + 8 * 2**20, 16 * 2**20), 48 * 2**20))


# ----------------------------------------------------------------------------
# XPOS factors (duplicate-interleaved, matching the PyTorch XPOS) and the
# conversion of factors / weights into the kernel's split head layout.
# ----------------------------------------------------------------------------
def _xpos_factors(seq_len, head_dim, scale_base=512.0):
    """Returns (cos_q, sin_q, cos_k, sin_k), each (seq_len, head_dim) f32."""
    half = head_dim // 2
    scale_vec = (jnp.arange(0, head_dim, 2, dtype=jnp.float32) + 0.4 * head_dim) / (1.4 * head_dim)
    power = jnp.arange(seq_len, dtype=jnp.float32)[:, None] / scale_base
    scale = scale_vec[None, :] ** power                                  # (S, half)

    inv_freq = 1.0 / (10000.0 ** (jnp.arange(half, dtype=jnp.float32) / half))
    sinusoid = jnp.arange(seq_len, dtype=jnp.float32)[:, None] * inv_freq[None, :]
    sin = jnp.sin(sinusoid)
    cos = jnp.cos(sinusoid)

    def dup(m):  # duplicate_interleave: (S, half) -> (S, head_dim)
        return jnp.repeat(m, 2, axis=1)

    cos_q = dup(cos * scale)
    sin_q = dup(sin * scale)
    inv_scale = 1.0 / scale                                              # downscale branch
    cos_k = dup(cos * inv_scale)
    sin_k = dup(sin * inv_scale)
    return cos_q, sin_q, cos_k, sin_k


def _factors_to_split(cos, sin, half_pad):
    """Duplicate-interleaved (S, Dh) factors -> split head layout (S, 2*half_pad).

    Split layout: lane p < half_pad holds pair element 2p, lane half_pad + p holds
    element 2p+1.  The +/- signs of rotate_every_two are folded into sin so that
    in-kernel:  x_out = x * cos_split + roll(x, half_pad, axis=1) * sin_split.
    """
    half = cos.shape[1] // 2
    pad = ((0, 0), (0, half_pad - half))
    c = jnp.pad(cos[:, 0::2], pad)
    s = jnp.pad(sin[:, 0::2], pad)
    return jnp.concatenate([c, c], axis=1), jnp.concatenate([-s, s], axis=1)


def _weights_to_split(w, half_pad):
    """(H, Dh) projection weight -> (H, 2*half_pad) in the split head layout."""
    pad = ((0, 0), (0, half_pad - w.shape[1] // 2))
    a = jnp.pad(w[:, 0::2], pad)
    b = jnp.pad(w[:, 1::2], pad)
    return jnp.concatenate([a, b], axis=1)


# ----------------------------------------------------------------------------
# Kernel 1: fused QKV projection + xpos (bf16 MXU, XLU roll for the rotation)
# ----------------------------------------------------------------------------
def _qkv_xpos_kernel(x_ref, w_ref, cq_ref, sq_ref, ck_ref, sk_ref,
                     q_ref, k_ref, v_ref, *, dh_pad):
    x = x_ref[0]                                                        # (TS, H) bf16
    qkv = jnp.dot(x, w_ref[...], preferred_element_type=jnp.float32)   # (TS, 2*Dh+Dv) f32
    q = qkv[:, :dh_pad]
    k = qkv[:, dh_pad:2 * dh_pad]
    v = qkv[:, 2 * dh_pad:]

    half = dh_pad // 2
    # xpos: x*cos + rotate_every_two(x)*sin.  In the split head layout the
    # rotation is a half-width lane roll (XLU); signs are folded into sin_split.
    # NOTE: pltpu.roll requires a non-negative axis.
    q_rot = pltpu.roll(q, shift=half, axis=1)
    k_rot = pltpu.roll(k, shift=half, axis=1)
    q_ref[0] = (q * cq_ref[...] + q_rot * sq_ref[...]).astype(q_ref.dtype)
    k_ref[0] = (k * ck_ref[...] + k_rot * sk_ref[...]).astype(k_ref.dtype)
    v_ref[0] = v.astype(v_ref.dtype)


# ----------------------------------------------------------------------------
# Kernel 2: flash-style tiled retention, decay hoisted out of the hot loop
# ----------------------------------------------------------------------------
def _retention_kernel(ddiag_ref, q_ref, k_ref, v_ref, o_ref, acc_ref,
                      *, t, log_gamma):
    qi = pl.program_id(1)
    ki = pl.program_id(2)

    @pl.when(ki == 0)
    def _init():
        acc_ref[...] = jnp.zeros_like(acc_ref)

    def scores():
        # Q @ K^T without an explicit transpose: contract both minor (lane) dims.
        return jax.lax.dot_general(
            q_ref[0], k_ref[0], dimension_numbers=(((1,), (1,)), ((), ())),
            preferred_element_type=jnp.float32)                         # (t, t) f32

    @pl.when(ki == qi)
    def _diag():
        # Diagonal tile: precomputed masked decay constant (VMEM-resident).
        s = scores() * ddiag_ref[...]
        acc_ref[...] += jnp.dot(s.astype(jnp.bfloat16), v_ref[0],
                                preferred_element_type=jnp.float32)

    @pl.when(ki < qi)
    def _below():
        # Strictly-below-diagonal tile: separable decay
        #   gamma^(n-m) = gamma^ln * gamma^((qi-ki)*t - lm),  both factors <= 1.
        s = scores()
        ln = jax.lax.broadcasted_iota(jnp.int32, (t, 1), 0).astype(jnp.float32)
        lm = jax.lax.broadcasted_iota(jnp.int32, (1, t), 1).astype(jnp.float32)
        row = jnp.exp(ln * log_gamma)                                   # (t, 1)
        blk = ((qi - ki) * t).astype(jnp.float32)
        col = jnp.exp((blk - lm) * log_gamma)                           # (1, t)
        s = s * row * col
        acc_ref[...] += jnp.dot(s.astype(jnp.bfloat16), v_ref[0],
                                preferred_element_type=jnp.float32)

    @pl.when(ki == pl.num_programs(2) - 1)
    def _store():
        o_ref[0] = acc_ref[...].astype(o_ref.dtype)


# ----------------------------------------------------------------------------
# Wrapper
# ----------------------------------------------------------------------------
def simple_retention_forward(X, W_Q, W_K, W_V, gamma, *,
                             tile_ret=512, tile_proj=512):
    """Parallel retention: ((X W_Q)~xpos @ ((X W_K)~xpos)^T * D) @ (X W_V)."""
    B, S, H = X.shape
    Dh = W_Q.shape[1]
    Dv = W_V.shape[1]
    assert Dh % 2 == 0, "xpos (rotate_every_two) requires an even head size"
    # gamma must be a concrete Python/NumPy scalar (folded into the kernel).
    log_gamma = math.log(float(gamma))

    half_pad = _round_up(Dh // 2, 64)          # padded head dim = multiple of 128
    dh_pad = 2 * half_pad
    dv_pad = _round_up(Dv, 128)
    wtot = 2 * dh_pad + dv_pad

    ts = _choose_tile(S, tile_proj)
    t = _choose_tile(S, tile_ret)              # tq == tk (required by diag decay)
    nq = S // t

    # ---- constant operand prep (plain JAX) ----
    cos_q, sin_q, cos_k, sin_k = _xpos_factors(S, Dh)
    cq, sq = _factors_to_split(cos_q, sin_q, half_pad)        # (S, dh_pad)
    ck, sk = _factors_to_split(cos_k, sin_k, half_pad)
    cq, sq, ck, sk = (a.astype(jnp.bfloat16) for a in (cq, sq, ck, sk))

    w_all = jnp.concatenate(
        [_weights_to_split(W_Q, half_pad),
         _weights_to_split(W_K, half_pad),
         jnp.pad(W_V, ((0, 0), (0, dv_pad - Dv)))],
        axis=1).astype(jnp.bfloat16)
    x_bf16 = X.astype(jnp.bfloat16)

    # Masked decay constant for the diagonal tile (same for every qi with tq==tk).
    ln = jnp.arange(t, dtype=jnp.float32)[:, None]
    lm = jnp.arange(t, dtype=jnp.float32)[None, :]
    decay_diag = jnp.where(ln >= lm, jnp.exp((ln - lm) * log_gamma), 0.0)

    # ---- kernel 1: fused QKV projection + xpos ----
    # Working set: x (dbl), w, 4 factor tiles (dbl), f32 qkv intermediate, outputs (dbl).
    ws1 = (2 * ts * H * 2 + H * wtot * 2 + 2 * 4 * ts * dh_pad * 2
           + ts * wtot * 4 + 2 * ts * wtot * 2)
    q, k, v = pl.pallas_call(
        functools.partial(_qkv_xpos_kernel, dh_pad=dh_pad),
        out_shape=(jax.ShapeDtypeStruct((B, S, dh_pad), jnp.bfloat16),
                   jax.ShapeDtypeStruct((B, S, dh_pad), jnp.bfloat16),
                   jax.ShapeDtypeStruct((B, S, dv_pad), jnp.bfloat16)),
        grid_spec=pltpu.PrefetchScalarGridSpec(
            num_scalar_prefetch=0,
            # (seq-tile, batch): factor index_maps are constant across the inner
            # batch axis, so factor tiles are fetched once per seq-tile, not per B.
            grid=(S // ts, B),
            in_specs=[
                pl.BlockSpec((1, ts, H), lambda si, b: (b, si, 0)),     # X
                pl.BlockSpec((H, wtot), lambda si, b: (0, 0)),          # fused W_QKV
                pl.BlockSpec((ts, dh_pad), lambda si, b: (si, 0)),      # cos_q
                pl.BlockSpec((ts, dh_pad), lambda si, b: (si, 0)),      # sin_q (signed)
                pl.BlockSpec((ts, dh_pad), lambda si, b: (si, 0)),      # cos_k
                pl.BlockSpec((ts, dh_pad), lambda si, b: (si, 0)),      # sin_k (signed)
            ],
            out_specs=[
                pl.BlockSpec((1, ts, dh_pad), lambda si, b: (b, si, 0)),
                pl.BlockSpec((1, ts, dh_pad), lambda si, b: (b, si, 0)),
                pl.BlockSpec((1, ts, dv_pad), lambda si, b: (b, si, 0)),
            ]),
        compiler_params=pltpu.CompilerParams(
            dimension_semantics=("parallel", "parallel"),
            vmem_limit_bytes=_vmem_limit(ws1)),
        cost_estimate=pl.CostEstimate(
            flops=int(2 * B * S * H * wtot),
            transcendentals=0,
            bytes_accessed=int(B * S * H * 2 + H * wtot * 2
                               + 4 * S * dh_pad * 2
                               + B * S * wtot * 2)),
    )(x_bf16, w_all, cq, sq, ck, sk)

    # ---- kernel 2: flash-style tiled retention ----
    # Working set: decay const (dbl), Q/K/V (dbl), output (dbl), f32 acc scratch,
    # plus the in-kernel (t, t) f32 score and its bf16 copy.
    ws2 = (2 * t * t * 4 + 2 * t * dh_pad * 2 * 2 + 2 * t * dv_pad * 2
           + 2 * t * dv_pad * 4 + t * dv_pad * 4 + t * t * 4 + t * t * 2)
    n_causal_pairs = nq * (nq + 1) // 2
    out = pl.pallas_call(
        functools.partial(_retention_kernel, t=t, log_gamma=log_gamma),
        out_shape=jax.ShapeDtypeStruct((B, S, dv_pad), jnp.float32),
        grid_spec=pltpu.PrefetchScalarGridSpec(
            num_scalar_prefetch=0,
            grid=(B, nq, nq),
            in_specs=[
                # Diagonal decay constant: constant index_map -> fetched once.
                pl.BlockSpec((t, t), lambda b, qi, ki: (0, 0)),
                pl.BlockSpec((1, t, dh_pad), lambda b, qi, ki: (b, qi, 0)),   # Q
                # K/V clamped to the causal boundary: above-diagonal steps revisit
                # the same block index so no new DMA is issued for skipped tiles.
                pl.BlockSpec((1, t, dh_pad),
                             lambda b, qi, ki: (b, jnp.minimum(ki, qi), 0)),  # K
                pl.BlockSpec((1, t, dv_pad),
                             lambda b, qi, ki: (b, jnp.minimum(ki, qi), 0)),  # V
            ],
            out_specs=pl.BlockSpec((1, t, dv_pad), lambda b, qi, ki: (b, qi, 0)),
            scratch_shapes=[pltpu.VMEM((t, dv_pad), jnp.float32)]),
        compiler_params=pltpu.CompilerParams(
            dimension_semantics=("parallel", "parallel", "arbitrary"),
            vmem_limit_bytes=_vmem_limit(ws2)),
        cost_estimate=pl.CostEstimate(
            flops=int(2 * B * n_causal_pairs * t * t * (dh_pad + dv_pad)),
            transcendentals=int(B * n_causal_pairs * 2 * t),
            bytes_accessed=int(B * S * dh_pad * 2
                               + B * n_causal_pairs * t * (dh_pad + dv_pad) * 2
                               + B * S * dv_pad * 4
                               + t * t * 4)),
    )(decay_diag, q, k, v)

    return out[:, :, :Dv]


# ----------------------------------------------------------------------------
# Pure-JAX reference (mirrors the PyTorch module's forward, mask=None path)
# ----------------------------------------------------------------------------
def simple_retention_reference(X, W_Q, W_K, W_V, gamma):
    S = X.shape[1]
    Dh = W_Q.shape[1]
    cos_q, sin_q, cos_k, sin_k = _xpos_factors(S, Dh)

    n = jnp.arange(S, dtype=jnp.float32)[:, None]
    m = jnp.arange(S, dtype=jnp.float32)[None, :]
    D = jnp.where(n >= m, jnp.float32(gamma) ** (n - m), 0.0)

    def rot2(x):  # rotate_every_two
        x1 = x[..., ::2]
        x2 = x[..., 1::2]
        return jnp.stack((-x2, x1), axis=-1).reshape(x.shape)

    Q = X @ W_Q
    K = X @ W_K
    V = X @ W_V
    Q = Q * cos_q[None] + rot2(Q) * sin_q[None]
    K = K * cos_k[None] + rot2(K) * sin_k[None]
    ret = jnp.einsum("bqd,bkd->bqk", Q, K) * D[None]
    return jnp.einsum("bqk,bkv->bqv", ret, V)


if __name__ == "__main__":
    # Small shapes consistent with the module: batch=2, seq=8, hidden=32,
    # head_size=hidden (default), double_v_dim=False -> v_dim=32.
    # TODO(synk): only the parallel forward (mask=None) is implemented;
    # forward_recurrent / forward_chunkwise are out of scope for this kernel.
    batch, seq, hidden = 2, 8, 32
    head_size = hidden
    v_dim = head_size
    gamma = 0.9

    key = jax.random.PRNGKey(0)
    kx, kq, kk, kv = jax.random.split(key, 4)
    X = jax.random.normal(kx, (batch, seq, hidden), dtype=jnp.float32)
    W_Q = jax.random.normal(kq, (hidden, head_size), dtype=jnp.float32) / hidden
    W_K = jax.random.normal(kk, (hidden, head_size), dtype=jnp.float32) / hidden
    W_V = jax.random.normal(kv, (hidden, v_dim), dtype=jnp.float32) / hidden

    out = jax.block_until_ready(simple_retention_forward(X, W_Q, W_K, W_V, gamma))
    ref = jax.block_until_ready(simple_retention_reference(X, W_Q, W_K, W_V, gamma))

    assert out.shape == (batch, seq, v_dim)
    max_diff = float(jnp.max(jnp.abs(out - ref)))
    # bf16 MXU operands with f32 accumulation -> loosened tolerance vs pure-f32 ref.
    assert jnp.allclose(out, ref, rtol=5e-2, atol=2e-2), f"max abs diff = {max_diff}"
    print("KERNEL_OK")
</pallas_src>

<mosaic_0001>
module attributes {stable_mosaic.version = 11 : i64} {
  func.func @_qkv_xpos_kernel(%arg0: i32, %arg1: i32, %arg2: memref<1x8x32xbf16, #tpu.memory_space<vmem>>, %arg3: memref<32x384xbf16, #tpu.memory_space<vmem>>, %arg4: memref<8x128xbf16, #tpu.memory_space<vmem>>, %arg5: memref<8x128xbf16, #tpu.memory_space<vmem>>, %arg6: memref<8x128xbf16, #tpu.memory_space<vmem>>, %arg7: memref<8x128xbf16, #tpu.memory_space<vmem>>, %arg8: memref<1x8x128xbf16, #tpu.memory_space<vmem>>, %arg9: memref<1x8x128xbf16, #tpu.memory_space<vmem>>, %arg10: memref<1x8x128xbf16, #tpu.memory_space<vmem>>) attributes {dimension_semantics = [#tpu.dimension_semantics<parallel>, #tpu.dimension_semantics<parallel>], iteration_bounds = array<i64: 1, 2>, scalar_prefetch = 0 : i64, scratch_operands = 0 : i64, tpu.core_type = #tpu.core_type<tc>, window_params = [{transform_indices = @transform_0, window_bounds = array<i64: 1, 8, 32>}, {pipeline_mode = #tpu.pipeline_mode<synchronous>, transform_indices = @transform_1, window_bounds = array<i64: 32, 384>}, {transform_indices = @transform_2, window_bounds = array<i64: 8, 128>}, {transform_indices = @transform_3, window_bounds = array<i64: 8, 128>}, {transform_indices = @transform_4, window_bounds = array<i64: 8, 128>}, {transform_indices = @transform_5, window_bounds = array<i64: 8, 128>}, {transform_indices = @transform_6, window_bounds = array<i64: 1, 8, 128>}, {transform_indices = @transform_7, window_bounds = array<i64: 1, 8, 128>}, {transform_indices = @transform_8, window_bounds = array<i64: 1, 8, 128>}]} {
    %c0 = arith.constant 0 : index
    %c0_0 = arith.constant 0 : index
    %c0_1 = arith.constant 0 : index
    %0 = vector.load %arg2[%c0, %c0_0, %c0_1] : memref<1x8x32xbf16, #tpu.memory_space<vmem>>, vector<1x8x32xbf16>
    %1 = vector.shape_cast %0 : vector<1x8x32xbf16> to vector<8x32xbf16>
    %c0_2 = arith.constant 0 : index
    %c0_3 = arith.constant 0 : index
    %2 = vector.load %arg3[%c0_2, %c0_3] : memref<32x384xbf16, #tpu.memory_space<vmem>>, vector<32x384xbf16>
    %cst = arith.constant dense<0.000000e+00> : vector<8x384xf32>
    %3 = tpu.matmul %1, %2, %cst {dimension_numbers = #tpu.dot_dimension_numbers<[1], [0], [0], [1], [0, 0, 1, 1], [], []>} : vector<8x32xbf16>, vector<32x384xbf16>, vector<8x384xf32> -> vector<8x384xf32>
    %4 = vector.extract_strided_slice %3 {offsets = [0, 0], sizes = [8, 128], strides = [1, 1]} : vector<8x384xf32> to vector<8x128xf32>
    %5 = vector.extract_strided_slice %3 {offsets = [0, 128], sizes = [8, 128], strides = [1, 1]} : vector<8x384xf32> to vector<8x128xf32>
    %6 = vector.extract_strided_slice %3 {offsets = [0, 256], sizes = [8, 128], strides = [1, 1]} : vector<8x384xf32> to vector<8x128xf32>
    %c64_i32 = arith.constant 64 : i32
    %7 = tpu.dynamic_rotate %4 by %c64_i32 dim 1 : vector<8x128xf32>, i32 -> vector<8x128xf32>
    %c64_i32_4 = arith.constant 64 : i32
    %8 = tpu.dynamic_rotate %5 by %c64_i32_4 dim 1 : vector<8x128xf32>, i32 -> vector<8x128xf32>
    %c0_5 = arith.constant 0 : index
    %c0_6 = arith.constant 0 : index
    %9 = vector.load %arg4[%c0_5, %c0_6] : memref<8x128xbf16, #tpu.memory_space<vmem>>, vector<8x128xbf16>
    %10 = arith.extf %9 : vector<8x128xbf16> to vector<8x128xf32>
    %11 = arith.mulf %4, %10 : vector<8x128xf32>
    %c0_7 = arith.constant 0 : index
    %c0_8 = arith.constant 0 : index
    %12 = vector.load %arg5[%c0_7, %c0_8] : memref<8x128xbf16, #tpu.memory_space<vmem>>, vector<8x128xbf16>
    %13 = arith.extf %12 : vector<8x128xbf16> to vector<8x128xf32>
    %14 = arith.mulf %7, %13 : vector<8x128xf32>
    %15 = arith.addf %11, %14 : vector<8x128xf32>
    %16 = arith.truncf %15 : vector<8x128xf32> to vector<8x128xbf16>
    %c0_9 = arith.constant 0 : index
    %c0_10 = arith.constant 0 : index
    %c0_11 = arith.constant 0 : index
    %17 = vector.load %arg8[%c0_9, %c0_10, %c0_11] : memref<1x8x128xbf16, #tpu.memory_space<vmem>>, vector<1x8x128xbf16>
    %18 = vector.shape_cast %17 : vector<1x8x128xbf16> to vector<8x128xbf16>
    %19 = vector.shape_cast %16 : vector<8x128xbf16> to vector<1x8x128xbf16>
    tpu.vector_store %arg8[%c0_9, %c0_10, %c0_11], %19 {strides = array<i32>} : memref<1x8x128xbf16, #tpu.memory_space<vmem>>, vector<1x8x128xbf16>,
    %c0_12 = arith.constant 0 : index
    %c0_13 = arith.constant 0 : index
    %20 = vector.load %arg6[%c0_12, %c0_13] : memref<8x128xbf16, #tpu.memory_space<vmem>>, vector<8x128xbf16>
    %21 = arith.extf %20 : vector<8x128xbf16> to vector<8x128xf32>
    %22 = arith.mulf %5, %21 : vector<8x128xf32>
    %c0_14 = arith.constant 0 : index
    %c0_15 = arith.constant 0 : index
    %23 = vector.load %arg7[%c0_14, %c0_15] : memref<8x128xbf16, #tpu.memory_space<vmem>>, vector<8x128xbf16>
    %24 = arith.extf %23 : vector<8x128xbf16> to vector<8x128xf32>
    %25 = arith.mulf %8, %24 : vector<8x128xf32>
    %26 = arith.addf %22, %25 : vector<8x128xf32>
    %27 = arith.truncf %26 : vector<8x128xf32> to vector<8x128xbf16>
    %c0_16 = arith.constant 0 : index
    %c0_17 = arith.constant 0 : index
    %c0_18 = arith.constant 0 : index
    %28 = vector.load %arg9[%c0_16, %c0_17, %c0_18] : memref<1x8x128xbf16, #tpu.memory_space<vmem>>, vector<1x8x128xbf16>
    %29 = vector.shape_cast %28 : vector<1x8x128xbf16> to vector<8x128xbf16>
    %30 = vector.shape_cast %27 : vector<8x128xbf16> to vector<1x8x128xbf16>
    tpu.vector_store %arg9[%c0_16, %c0_17, %c0_18], %30 {strides = array<i32>} : memref<1x8x128xbf16, #tpu.memory_space<vmem>>, vector<1x8x128xbf16>,
    %31 = arith.truncf %6 : vector<8x128xf32> to vector<8x128xbf16>
    %c0_19 = arith.constant 0 : index
    %c0_20 = arith.constant 0 : index
    %c0_21 = arith.constant 0 : index
    %32 = vector.load %arg10[%c0_19, %c0_20, %c0_21] : memref<1x8x128xbf16, #tpu.memory_space<vmem>>, vector<1x8x128xbf16>
    %33 = vector.shape_cast %32 : vector<1x8x128xbf16> to vector<8x128xbf16>
    %34 = vector.shape_cast %31 : vector<8x128xbf16> to vector<1x8x128xbf16>
    tpu.vector_store %arg10[%c0_19, %c0_20, %c0_21], %34 {strides = array<i32>} : memref<1x8x128xbf16, #tpu.memory_space<vmem>>, vector<1x8x128xbf16>,
    return
  }
  func.func @transform_0(%arg0: i32, %arg1: i32) -> (i32, i32, i32) {
    %c0_i32 = arith.constant 0 : i32
    %c0_i32_0 = arith.constant 0 : i32
    return %arg1, %arg0, %c0_i32 : i32, i32, i32
  }
  func.func @transform_1(%arg0: i32, %arg1: i32) -> (i32, i32) {
    %c0_i32 = arith.constant 0 : i32
    %c0_i32_0 = arith.constant 0 : i32
    %c0_i32_1 = arith.constant 0 : i32
    return %c0_i32, %c0_i32_0 : i32, i32
  }
  func.func @transform_2(%arg0: i32, %arg1: i32) -> (i32, i32) {
    %c0_i32 = arith.constant 0 : i32
    %c0_i32_0 = arith.constant 0 : i32
    return %arg0, %c0_i32 : i32, i32
  }
  func.func @transform_3(%arg0: i32, %arg1: i32) -> (i32, i32) {
    %c0_i32 = arith.constant 0 : i32
    %c0_i32_0 = arith.constant 0 : i32
    return %arg0, %c0_i32 : i32, i32
  }
  func.func @transform_4(%arg0: i32, %arg1: i32) -> (i32, i32) {
    %c0_i32 = arith.constant 0 : i32
    %c0_i32_0 = arith.constant 0 : i32
    return %arg0, %c0_i32 : i32, i32
  }
  func.func @transform_5(%arg0: i32, %arg1: i32) -> (i32, i32) {
    %c0_i32 = arith.constant 0 : i32
    %c0_i32_0 = arith.constant 0 : i32
    return %arg0, %c0_i32 : i32, i32
  }
  func.func @transform_6(%arg0: i32, %arg1: i32) -> (i32, i32, i32) {
    %c0_i32 = arith.constant 0 : i32
    %c0_i32_0 = arith.constant 0 : i32
    return %arg1, %arg0, %c0_i32 : i32, i32, i32
  }
  func.func @transform_7(%arg0: i32, %arg1: i32) -> (i32, i32, i32) {
    %c0_i32 = arith.constant 0 : i32
    %c0_i32_0 = arith.constant 0 : i32
    return %arg1, %arg0, %c0_i32 : i32, i32, i32
  }
  func.func @transform_8(%arg0: i32, %arg1: i32) -> (i32, i32, i32) {
    %c0_i32 = arith.constant 0 : i32
    %c0_i32_0 = arith.constant 0 : i32
    return %arg1, %arg0, %c0_i32 : i32, i32, i32
  }
}

</mosaic_0001>

<bundles_post_ra>
// kernel: tpu_custom_call.1
= control target key start
LH: loop header
LB: loop body
LE: loop exit
PB: predicated region body
PF: predicated region fallthrough
CT: control target
= control target key end

     0   :  { %s1595_s0 = inlined_call_operand.hbm [shape: bf16[2,8,32], index: 0, kind: input, shape index: {}]   ;;  %s1596_s1 = inlined_call_operand.hbm [shape: bf16[32,384], index: 1, kind: input, shape index: {}]   ;;  %s1597_s2 = inlined_call_operand.hbm [shape: bf16[8,128], index: 2, kind: input, shape index: {}]   ;;  %s1598_s3 = inlined_call_operand.hbm [shape: bf16[8,128], index: 3, kind: input, shape index: {}]   ;;  %s1599_s4 = inlined_call_operand.hbm [shape: bf16[8,128], index: 4, kind: input, shape index: {}]   ;;  %s1600_s5 = inlined_call_operand.vmem [shape: bf16[8,128], index: 5, kind: input, shape index: {}]   ;;  %s1601_s6 = inlined_call_operand.hbm [shape: bf16[2,8,128], index: 6, kind: output, shape index: {0}]   ;;  %s1602_s7 = inlined_call_operand.hbm [shape: bf16[2,8,128], index: 7, kind: output, shape index: {1}]   ;;  %s1603_s8 = inlined_call_operand.hbm [shape: bf16[2,8,128], index: 8, kind: output, shape index: {2}]  }
   0x1   :  { %1608 = sst [smem:[#allocation22_spill]] %s1595_s0 }
   0x2   :  { %1609 = sst [smem:[#allocation23_spill]] %s1596_s1 }
   0x3   :  { %1610 = sst [smem:[#allocation24_spill]] %s1597_s2 }
   0x4   :  { %1611 = sst [smem:[#allocation25_spill]] %s1598_s3 }
   0x5   :  { %14 = vsyncpa [#allocation3], 0 }
   0x6   :  { %16 = vsyncpa [#allocation3 + $0x1], 0 }
   0x7   :  { %17 = vsyncpa [#allocation6], 0 }
   0x8   :  { %18 = vsyncpa [#allocation9], 0 }
   0x9   :  { %19 = vsyncpa [#allocation4], 0 }
   0xa   :  { %21 = vsyncpa [#allocation4 + $0x1], 0 }
   0xb   :  { %22 = vsyncpa [#allocation13], 0 }
   0xc   :  { %24 = vsyncpa [#allocation13 + $0x1], 0  ;;  %s1361_s27 = smov 0   ;;  %s1363_s28 = smov 0  }
   0xd   :  { %s1365_s29 = smov 0   ;;  %s1367_s30 = smov 0  }
   0xe   :  { %s1369_s9 = smov 0   ;;  %s1371_s10 = smov 0  }
   0xf LB: > { %s1392_s11 = sadd.s32 4294967295, %s1307_s10   ;;  %p832_p0 = scmp.ge.s32.totalorder %s1307_s10, 1  ;;  %s1307_s10 = sphi %s1371_s10, %s30_s10   ;;  %s1303_s9 = sphi %s1369_s9, %s1633_s9   ;;  %s1299_s30 = sphi %s1367_s30, %s1632_s30   ;;  %s1295_s29 = sphi %s1365_s29, %s1631_s29   ;;  %s1291_s28 = sphi %s1363_s28, %s1630_s28   ;;  %s1287_s27 = sphi %s1361_s27, %s1629_s27  }
  0x10   : > { %p65_p1 = scmp.eq.s32.totalorder %s1392_s11, 0  ;;  %p284_p2 = scmp.lt.s32.totalorder %s1307_s10, 3 }
  0x11   : > { %s1612_s1 = sld [smem:[#allocation23_spill]]  ;;  %s1309_s16 = smov [#allocation5]  }
  0x12   : > { %p1400_p3 = pnand %p832_p0, %p284_p2  ;;  %s297_s17 = sshll.u32 %s1309_s16, 4  ;;  %s298_s17 = int_to_ptr.vmem [resolvable:$true] %s297_s17 }
  0x13   : > { %p838_p6 = scmp.ge.s32.totalorder %s1307_s10, 2  ;;  %s1615_s3 = sld [smem:[#allocation25_spill]] }
  0x14   : > { %p915_p4 = pneg %p1400_p3  ;;  %s1310_s22 = smov 192  }
  0x15   : > { %s1311_s23 = smov 12   ;;  %s1312_s24 = smov [#allocation8]  }
  0x16   : > { %p1408_p5 = pnand %p915_p4, %p65_p1  ;;  %s328_s25 = sshll.u32 %s1312_s24, 4  ;;  %s329_s25 = int_to_ptr.vmem [resolvable:$true] %s328_s25 }
  0x17   : > { %s295_s14 = sshll.u32 %s1612_s1, 4  ;;  %s1616_s2 = sld [smem:[#allocation24_spill]]  ;;  %s296_s14 = int_to_ptr.hbm [resolvable:$true] %s295_s14 }
  0x18   : > { %918 = dma.hbm_to_vmem [thread:$0]  (!%p1408_p5), %s296_s14, 768, %s298_s17, [#allocation6], %s1310_s22, %s1310_s22, %s1311_s23  }
  0x19   : > { %s326_s21 = sshll.u32 %s1615_s3, 4  ;;  %s340_s14 = sshll.u32 %s1599_s4, 4  ;;  %s327_s21 = int_to_ptr.hbm [resolvable:$true] %s326_s21  ;;  %s341_s14 = int_to_ptr.hbm [resolvable:$true] %s340_s14 }
  0x1a   : > { %924 = dma.hbm_to_vmem [thread:$0]  (!%p1408_p5), %s327_s21, 64, %s329_s25, [#allocation9]  }
  0x1b   : > { %s1313_s17 = smov [#allocation7]   ;;  %s1314_s22 = smov [#allocation10]  }
  0x1c   : > { %s314_s20 = sshll.u32 %s1313_s17, 4  ;;  %s342_s23 = sshll.u32 %s1314_s22, 4  ;;  %s315_s20 = int_to_ptr.vmem [resolvable:$true] %s314_s20  ;;  %s343_s23 = int_to_ptr.vmem [resolvable:$true] %s342_s23 }
  0x1d   : > { %s312_s13 = sshll.u32 %s1616_s2, 4  ;;  %s39_s21 = sadd.s32 1, %s1303_s9  ;;  %s313_s13 = int_to_ptr.hbm [resolvable:$true] %s312_s13 }
  0x1e   : > { %921 = dma.hbm_to_vmem [thread:$0]  (!%p1408_p5), %s313_s13, 64, %s315_s20, [#allocation6]  }
  0x1f   : > { %927 = dma.hbm_to_vmem [thread:$0]  (!%p1408_p5), %s341_s14, 64, %s343_s23, [#allocation9]  }
  0x20   : > { %s1604_s24 = sadd.s32 4294967294, %s1307_s10   ;;  %p40_p7 = scmp.ge.s32.totalorder %s39_s21, 2 }
  0x21   : > { %s51_s25 = sadd.s32 1, %s1295_s29  ;;  %p58_p8 = scmp.ne.s32.totalorder %s1295_s29, %s1291_s28 }
  0x22   : > { %s1635_s21 = smov (%p40_p7, %s39_s21), 0  ;;  %p59_p9 = scmp.eq.s32.totalorder %s1307_s10, 0 }
  0x23   : > { %p64_p10 = scmp.ne.s32.totalorder %s1291_s28, %s1287_s27  ;;  %s46_s26 = ssub.s32 %s1303_s9, %s1635_s21 }
  0x24   : > { %p215_p11 = scmp.eq.s32.totalorder %s1392_s11, 1  ;;  %p49_p12 = scmp.eq.s32.totalorder %s46_s26, 0 }
  0x25   : > { %p1445_p13 = por %p65_p1, %p64_p10  ;;  %p221_p2 = scmp.eq.s32.totalorder %s1604_s24, 1 }
  0x26   : > { %p1449_p0 = por %p215_p11, %p58_p8  ;;  %p60_p4 = por %p59_p9, %p58_p8 }
  0x27   : > { %s1456_s13 = scalar_select %p49_p12, %s1295_s29, %s51_s25  }
  0x28   : > { %p1458_p5 = por %p221_p2, %p64_p10  ;;  %s360_s19 = sand.u32 1, %s1295_s29  }
  0x29   : > { %s840_s14 = sshll.u32 %s1303_s9, 2  ;;  %p946_p7 = scmp.lt.s32.totalorder %s1307_s10, 2 }
  0x2a   : > { %s839_s17 = sshll.u32 %s360_s19, 2  ;;  %s1620_s0 = sld [smem:[#allocation22_spill]] }
  0x2b   : > { %s364_s1 = scalar_lea.vmem [#allocation2], %s839_s17  ;;  %p929_p11 = pnand %p946_p7, %p60_p4 }
  0x2c   : > { %s373_s2 = sshll.u32 %s364_s1, 4  ;;  %s361_s25 = scalar_lea.sflag [#allocation3], %s360_s19  ;;  %s374_s2 = int_to_ptr.vmem [resolvable:$true] %s373_s2 }
  0x2e   : > { %382 = sbr.rel (%p1400_p3) target bundleno = 354 (0x162), region = 44 }
  0x30   : > { %s369_s23 = scalar_lea.hbm %s1620_s0, %s840_s14 }
  0x31   : > { %s371_s26 = sshll.u32 %s369_s23, 4  ;;  %s372_s26 = int_to_ptr.hbm [resolvable:$true] %s371_s26 }
  0x32   : > { %931 = dma.hbm_to_vmem [thread:$0]  (!%p929_p11), %s372_s26, 64, %s374_s2, %s361_s25  }
  0x33   : > { %s1471_s24 = sand.u32 1, %s1291_s28  }
  0x34   : > { %s1474_s3 = sshll.u32 %s1471_s24, 2  ;;  %s385_s14 = scalar_lea.sflag [#allocation3], %s1471_s24 }
  0x35   : > { %s388_s17 = scalar_lea.vmem [#allocation2], %s1474_s3 }
  0x36   : > { %1266 = dma.done.wait (%p1445_p13), %s385_s14, 64  }
  0x37   : > { %1268 = vsyncadd (%p1445_p13), %s385_s14, 4294967232 }
  0x38   : > { %1270 = dma.done.wait (%p65_p1), [#allocation6], 832  }
  0x39   : > { %1272 = vsyncadd (%p65_p1), [#allocation6], 4294966464 }
  0x3a   : > { %1274 = dma.done.wait (%p65_p1), [#allocation9], 128  }
  0x3b   : > { %1276 = vsyncadd (%p65_p1), [#allocation9], 4294967168  ;;  %v864_v0 = vld [vmem:[#allocation5 + $0x18] sm:$0xf]  ;;  %v889_v1 = vld [vmem:[#allocation5 + $0x20] sm:$0xf0] }
  0x3c   : > { %v888_v2 = vld [vmem:[#allocation5 + $0x1c] sm:$0xf]  ;;  %v865_v3 = vor.u32 %v889_v1, %v864_v0  ;;  %v866_v4 = vld [vmem:[#allocation5 + $0x24] sm:$0xf0]  ;;  %v852_v5 = vld [vmem:[#allocation5] sm:$0xf] }
  0x3d   : > { %v886_v6 = vld [vmem:[#allocation5 + $0x8] sm:$0xf0]  ;;  %v869_v7 = vor.u32 %v888_v2, %v866_v4  ;;  %v885_v8 = vld [vmem:[#allocation5 + $0x4] sm:$0xf]  ;;  %v854_v9 = vld [vmem:[#allocation5 + $0xc] sm:$0xf0] }
  0x3e   : > { %512 = vmatpush.bf16.msra.mxu0 %v865_v3  ;;  %v853_v10 = vor.u32 %v886_v6, %v852_v5  ;;  %v872_v11 = vld [vmem:[#allocation5 + $0x20] sm:$0xf]  ;;  %v890_v12 = vld [vmem:[#allocation5 + $0x28] sm:$0xf0]  ;;  %v860_v13 = vld [vmem:[#allocation5 + $0x8] sm:$0xf]  ;;  %v857_v14 = vor.u32 %v885_v8, %v854_v9 }
  0x3f   : > { %525 = vmatpush.bf16.msra.mxu1 %v869_v7  ;;  %v873_v15 = vor.u32 %v890_v12, %v872_v11  ;;  %v887_v16 = vld [vmem:[#allocation5 + $0x10] sm:$0xf0]  ;;  %v461_v18 = vld [vmem:[%s388_s17] sm:$0xf]  ;;  %vm502_vm0 = vcmask 261120   ;;  %s1315_s1 = smov 64  }
  0x40   : > { %v861_v17 = vor.u32 %v887_v16, %v860_v13  ;;  %s455_s2 = scalar_lea.vmem [#allocation14], %s1474_s3  ;;  %v558_v26 = vld [vmem:[#allocation10] sm:$0xf]  ;;  %s1495_s19 = sshll.u32 %s1299_s30, 2  ;;  %v549_v33 = vld [vmem:[#allocation7] sm:$0xf] }
  0x41   : > { %538 = vmatpush.bf16.msra.mxu2 %v873_v15  ;;  %v561_v27 = vld [vmem:[%s1600_s5] sm:$0xf]  ;;  %v559_v28 = vunpack.c.l.bf16 %v558_v26  ;;  %s606_s23 = scalar_lea.hbm %s1602_s7, %s1495_s19  ;;  %s621_s14 = scalar_lea.hbm %s1603_s8, %s1495_s19  ;;  %v552_v34 = vld [vmem:[#allocation8] sm:$0xf]  ;;  %v550_v36 = vunpack.c.l.bf16 %v549_v33 }
  0x42   : > { %513 = vmatpush.bf16.msra.mxu0 %v853_v10  ;;  %v562_v29 = vunpack.c.l.bf16 %v561_v27  ;;  %s574_s17 = sand.u32 1, %s1392_s11   ;;  %s448_s30 = scalar_lea.vmem [#allocation12], %s1474_s3  ;;  %v553_v38 = vunpack.c.l.bf16 %v552_v34 }
  0x43   : > { %526 = vmatpush.bf16.msra.mxu1 %v857_v14  ;;  %s1509_s15 = sshll.u32 %s606_s23, 4  ;;  %s1511_s18 = sshll.u32 %s455_s2, 4  ;;  %s611_s15 = int_to_ptr.hbm [resolvable:$true] %s1509_s15 }
  0x44   : > { %1621 = sst [smem:[#allocation20_spill]] %s1511_s18  ;;  %s1513_s20 = sshll.u32 %s621_s14, 4 }
  0x45   : > { %874 = vmatmul.msk.bf16.vlgmr.msra.gmra.mxu0 %vm502_vm0, %v461_v18  ;;  %539 = vmatpush.bf16.msra.mxu2 %v861_v17  ;;  %1622 = sst [smem:[#allocation21_spill]] %s1513_s20  ;;  %s591_s23 = scalar_lea.hbm %s1601_s6, %s1495_s19 }
  0x46   : > { %875 = vmatmul.msk.bf16.vlgmr.msra.gmra.mxu1 %vm502_vm0, %v461_v18  ;;  %s1171_s26 = sshra.s32 %s611_s15, 4  ;;  %s1177_s18 = scalar_lea.hbm %s1602_s7, 8  ;;  %s1172_s26 = int_to_ptr.hbm [resolvable:$true] %s1171_s26 }
  0x47   : > { %s1173_s25 = scalar_lea.hbm %s1172_s26, 4  ;;  %p1178_p9 = scmp.lt.s32.totalorder %s1172_s26, %s1602_s7 }
  0x48   : > { %876 = vmatmul.msk.bf16.vlgmr.msra.gmra.mxu2 %vm502_vm0, %v461_v18  ;;  %p1174_p1 = scmp.ne.s32.totalorder %s1172_s26, %s1173_s25  ;;  %p1179_p10 = scmp.lt.s32.totalorder %s1177_s18, %s1173_s25 }
  0x4a   : > { %p1175_p3 = pnand %p1174_p1, %p1449_p0  ;;  %p1180_p12 = por %p1179_p10, %p1178_p9 }
  0x4c   : > { %p1176_p8 = pneg %p1175_p3 }
  0x4e   : > { %p1181_p13 = pnand %p1180_p12, %p1176_p8 }
  0xc2   : > { %v515_v19 = vpop.f32.mrf.mxu0 }
  0xc3   : > { %v528_v20 = vpop.f32.mrf.mxu1 }
  0xc4   : > { %547 = vrot.lane.b32.xlu0 %v528_v20, %s1315_s1  ;;  %v560_v31 = vmul.f32 %v559_v28, %v528_v20 }
  0xca   : > { %v517_v21 = vpop.f32.mrf.mxu0 }
  0xcb   : > { %v530_v22 = vpop.f32.mrf.mxu1  ;;  %v541_v23 = vpop.f32.mrf.mxu2 }
  0xcc   : > { %545 = vrot.lane.b32.xlu0 %v515_v19, %s1315_s1  ;;  %v567_v24 = vpack.c.bf16 %v541_v23, %v541_v23  ;;  %s1507_s1 = sshll.u32 %s448_s30, 4  ;;  %s609_s1 = int_to_ptr.vmem [resolvable:$true] %s1507_s1 }
  0xce   : > { %568 = vst [vmem:[%s455_s2] sm:$0xf] %v567_v24  ;;  %s1523_s2 = scalar_lea.sflag [#allocation13], %s574_s17 }
  0xd3   : > { %v543_v25 = vpop.f32.mrf.mxu2 }
 0x136   : > { %v548_v30 = vpop.permute.xlu0 %547 }
 0x137   : > { %v563_v32 = vmul.f32 %v562_v29, %v548_v30 }
 0x139   : > { %v564_v35 = vadd.f32 %v563_v32, %v560_v31 }
 0x13b   : > { %v565_v37 = vpack.c.bf16 %v564_v35, %v564_v35 }
 0x13d   : > { %566 = vst [vmem:[%s448_s30] sm:$0xf] %v565_v37 }
 0x13e   : > { %v546_v39 = vpop.permute.xlu0 %545 }
 0x13f   : > { %1184 = shalt.err (!%p1181_p13)
}
 0x140   : > { %s1623_s17 = sld [smem:[#allocation21_spill]]  ;;  %v551_v40 = vmul.f32 %v550_v36, %v515_v19  ;;  %v554_v41 = vmul.f32 %v553_v38, %v546_v39  ;;  %s1205_s26 = scalar_lea.hbm %s1603_s8, 8 }
 0x141   : > { %910 = dma.vmem_to_hbm [thread:$0]  (%p1449_p0), %s609_s1, 64, %s611_s15, %s1523_s2  }
 0x146   : > { %s1624_s11 = int_to_ptr.hbm [resolvable:$true] %s1623_s17 }
 0x147   : > { %s1199_s22 = sshra.s32 %s1624_s11, 4  ;;  %s1200_s22 = int_to_ptr.hbm [resolvable:$true] %s1199_s22 }
 0x148   : > { %s1201_s0 = scalar_lea.hbm %s1200_s22, 4  ;;  %p1206_p11 = scmp.lt.s32.totalorder %s1200_s22, %s1603_s8 }
 0x149   : > { %p1202_p2 = scmp.ne.s32.totalorder %s1200_s22, %s1201_s0  ;;  %p1207_p1 = scmp.lt.s32.totalorder %s1205_s26, %s1201_s0 }
 0x14b   : > { %p1203_p4 = pnand %p1202_p2, %p1449_p0  ;;  %p1208_p3 = por %p1207_p1, %p1206_p11 }
 0x14d   : > { %p1204_p7 = pneg %p1203_p4 }
 0x14f   : > { %p1209_p8 = pnand %p1208_p3, %p1204_p7 }
 0x151   : > { %1212 = shalt.err (!%p1209_p8)
}
 0x152   : > { %s1625_s1 = smov %s1624_s11  ;;  %s1626_s15 = sld [smem:[#allocation20_spill]]  ;;  %v555_v42 = vadd.f32 %v554_v41, %v551_v40 }
 0x153   : > { %s441_s11 = scalar_lea.vmem [#allocation11], %s1474_s3  ;;  %s595_s0 = sshll.u32 %s591_s23, 4  ;;  %s596_s0 = int_to_ptr.hbm [resolvable:$true] %s595_s0 }
 0x154   : > { %s593_s18 = sshll.u32 %s441_s11, 4  ;;  %v556_v43 = vpack.c.bf16 %v555_v42, %v555_v42  ;;  %s570_s17 = scalar_lea.sflag [#allocation4], %s1471_s24  ;;  %s594_s18 = int_to_ptr.vmem [resolvable:$true] %s593_s18 }
 0x155   : > { %s1227_s26 = sshra.s32 %s596_s0, 4  ;;  %s1233_s14 = scalar_lea.hbm %s1601_s6, 8  ;;  %s1228_s26 = int_to_ptr.hbm [resolvable:$true] %s1227_s26 }
 0x156   : > { %557 = vst [vmem:[%s441_s11] sm:$0xf] %v556_v43  ;;  %s1229_s25 = scalar_lea.hbm %s1228_s26, 4  ;;  %p1234_p13 = scmp.lt.s32.totalorder %s1228_s26, %s1601_s6 }
 0x157   : > { %p1230_p9 = scmp.ne.s32.totalorder %s1228_s26, %s1229_s25  ;;  %p1235_p2 = scmp.lt.s32.totalorder %s1233_s14, %s1229_s25 }
 0x158   : > { %s1627_s30 = int_to_ptr.vmem [resolvable:$true] %s1626_s15 }
 0x159   : > { %911 = dma.vmem_to_hbm [thread:$0]  (%p1449_p0), %s1627_s30, 64, %s1625_s1, %s1523_s2  }
 0x15a   : > { %p1231_p10 = pnand %p1230_p9, %p1449_p0  ;;  %p1236_p4 = por %p1235_p2, %p1234_p13 }
 0x15c   : > { %p1232_p12 = pneg %p1231_p10 }
 0x15e   : > { %p1237_p7 = pnand %p1236_p4, %p1232_p12 }
 0x160   : > { %1240 = shalt.err (!%p1237_p7)
}
 0x161   : > { %909 = dma.vmem_to_hbm [thread:$0]  (%p1449_p0), %s594_s18, 64, %s596_s0, %s570_s17  }
 0x162 PF: > { %s637_s24 = sand.u32 1, %s1287_s27   ;;  %p933_p11 = pnand %p838_p6, %p1458_p5 }
 0x163   : > { %s638_s23 = scalar_lea.sflag [#allocation4], %s637_s24 }
 0x164   : > { %p934_p1 = pneg %p933_p11 }
 0x166   : > { %1278 = dma.done.wait (%p934_p1), %s638_s23, 64  }
 0x167   : > { %1280 = vsyncadd (%p934_p1), %s638_s23, 4294967232  ;;  %s1628_s15 = sadd.s32 4294967294, %s1307_s10  }
 0x168   : > { %s647_s30 = sand.u32 1, %s1628_s15  }
 0x169   : > { %s648_s11 = scalar_lea.sflag [#allocation13], %s647_s30 }
 0x16a   : > { %1282 = dma.done.wait (%p934_p1), %s648_s11, 128  }
 0x16b   : > { %1284 = vsyncadd (%p934_p1), %s648_s11, 4294967168  ;;  %s30_s10 = sadd.s32 1, %s1307_s10   ;;  %s1629_s27 = smov %s1291_s28 }
 0x16c   : > { %p27_p0 = scmp.ge.s32.totalorder %s30_s10, 4   ;;  %s1630_s28 = smov %s1295_s29 }
 0x16d   : > { %s1631_s29 = smov %s1456_s13  ;;  %s1632_s30 = smov %s1303_s9 }
 0x16e   : > { %s1633_s9 = smov %s1635_s21  ;;  %29 = sbr.rel (!%p27_p0) target bundleno = 15 (0xf), region = 143 }
 0x173   :  { %664 = vsyncpa [#allocation3], 1 }
 0x174   :  { %666 = vsyncpa [#allocation3 + $0x1], 1 }
 0x175   :  { %667 = vsyncpa [#allocation6], 1 }
 0x176   :  { %668 = vsyncpa [#allocation9], 1 }
 0x177   :  { %669 = vsyncpa [#allocation4], 1 }
 0x178   :  { %671 = vsyncpa [#allocation4 + $0x1], 1 }
 0x179   :  { %672 = vsyncpa [#allocation13], 1 }
 0x17a   :  { %674 = vsyncpa [#allocation13 + $0x1], 1 }

</bundles_post_ra>
